<compile_context>
chip_gen: v7x
topology: tpu7x:2x2x1
jax: 0.10.0
libtpu: 0.0.40
codegen_flags: <defaults>
</compile_context>

<pallas_src>
import functools

import jax
import jax.numpy as jnp
from jax import lax
from jax.experimental import pallas as pl
from jax.experimental.pallas import tpu as pltpu


def _round_up(x, m):
    return (x + m - 1) // m * m


# Keep the recurrent kernel's VMEM working set v7x-safe (64 MiB physical VMEM).
_VMEM_TILE_BUDGET = 40 * 1024 * 1024


def _vmem_limit(ws_bytes):
    # Never request below the 32 MiB scoped default; keep headroom for internal scratch.
    return int(min(max(ws_bytes + (4 << 20), 32 << 20), 64 << 20))


# ----------------------------------------------------------------------------
# Kernel 1: sequential tanh recurrence over time chunks.
#   h_t = tanh(xproj_t + h_{t-1} @ W_hh^T)   with xproj_t = W_ih^T[token_t] + b
# ----------------------------------------------------------------------------
def _rnn_recurrence_kernel(xproj_ref, h0_ref, whh_ref, y_ref, hT_ref, h_carry,
                           *, tc, seq_len):
    c = pl.program_id(1)  # time-chunk index (sequential / "arbitrary")

    @pl.when(c == 0)
    def _():
        # New batch block: load the initial hidden state into the carry.
        h_carry[...] = h0_ref[...]

    # TODO(synk): for very large H_pad, feed whh_ref[...] directly inside `step`
    # if a bundle dump shows a vreg spill storm from this hoisted read.
    whh = whh_ref[...]  # (H_pad, H_pad), single-buffered VMEM resident
    w_dtype = whh.dtype

    def step(i, h):
        x = xproj_ref[i]  # (tb, H_pad): precomputed W_ih^T gather + bias
        h_new = jnp.tanh(
            x + jnp.dot(h.astype(w_dtype), whh, preferred_element_type=jnp.float32))
        if seq_len is not None:
            # Do not advance the recurrence past the true sequence length
            # (time axis padded up to a multiple of tc).
            t = c * tc + i
            h_new = jnp.where(t < seq_len, h_new, h)
        y_ref[i] = h_new.astype(y_ref.dtype)  # lane-dense (tb, H_pad) store
        return h_new

    h = lax.fori_loop(0, tc, step, h_carry[...], unroll=True)
    h_carry[...] = h

    @pl.when(c == pl.num_programs(1) - 1)
    def _():
        hT_ref[...] = h


# ----------------------------------------------------------------------------
# Kernel 2: output projection, consuming padded Y directly (no HBM round-trip).
#   logits[t, b, :] = Y[t, b, :] @ W_lin^T + b_lin
# ----------------------------------------------------------------------------
def _head_kernel(y_ref, w_ref, b_ref, o_ref):
    tcl, tb, hp = y_ref.shape
    # tb is a multiple of 8, so collapsing (tcl, tb) is a sublane-aligned view.
    y2 = y_ref[...].reshape(tcl * tb, hp)
    logits = (jnp.dot(y2, w_ref[...], preferred_element_type=jnp.float32)
              + b_ref[...])
    o_ref[...] = logits.reshape(tcl, tb, -1).astype(o_ref.dtype)


@functools.partial(jax.jit, static_argnames=("vocab_size", "tc", "use_bf16"))
def rnn_model_forward(inputs, state, params, vocab_size, tc=16, use_bf16=False):
    """inputs: (B, T) int32 token ids; state: (1, B, H) float32.

    Returns (output, new_state): output (T*B, vocab_size), new_state (1, B, H)."""
    B, T = inputs.shape
    H = state.shape[-1]
    V = vocab_size

    w_dtype = jnp.bfloat16 if use_bf16 else jnp.float32
    y_dtype = jnp.bfloat16 if use_bf16 else jnp.float32
    w_bytes = 2 if use_bf16 else 4
    y_bytes = 2 if use_bf16 else 4

    H_pad = _round_up(H, 128)                 # lane-dense hidden width

    # ---- tile selection (batch tile tb, time chunk tc) -----------------------
    tb = min(_round_up(B, 8), 256)            # up to 256 rows: fills v6e/v7x MXU
    if tb >= 16 and _round_up(B, tb) == tb:
        # Prefer >= 2 batch blocks so the "parallel" batch axis can shard
        # across both v7x TensorCores during the serial recurrence.
        tb = _round_up((tb + 1) // 2, 8)
    tc = max(1, min(tc, T))                   # never run more steps than T

    def _ws(tc_, tb_):
        return (2 * tc_ * tb_ * H_pad * 4          # xproj blocks (double-buffered)
                + 2 * tb_ * H_pad * 4              # h0 blocks
                + H_pad * H_pad * w_bytes          # W_hh (Buffered(1))
                + 2 * tc_ * tb_ * H_pad * y_bytes  # Y blocks
                + 2 * tb_ * H_pad * 4              # h_T blocks
                + tb_ * H_pad * 4)                 # carry scratch

    while _ws(tc, tb) > _VMEM_TILE_BUDGET and tc > 1:
        tc = max(1, tc // 2)
    while _ws(tc, tb) > _VMEM_TILE_BUDGET and tb > 8:
        tb = max(8, _round_up(tb // 2, 8))
    # TODO(synk): K-tile W_hh for hidden sizes where a single (H_pad, H_pad)
    #             tile alone exceeds the VMEM budget.

    B_pad = _round_up(B, tb)
    T_pad = _round_up(T, tc)
    seq_len = None if T_pad == T else T       # guard only when time is padded

    # ---- pad parameters (zeros keep the math exact) --------------------------
    wih_p = jnp.pad(params["wih_t"], ((0, 0), (0, H_pad - H)))            # (V, H_pad)
    b_p = jnp.pad(params["b_sum"], ((0, 0), (0, H_pad - H)))              # (1, H_pad)
    whh_p = jnp.pad(params["whh_t"],
                    ((0, H_pad - H), (0, H_pad - H))).astype(w_dtype)     # (H_pad, H_pad)

    # ---- input projection == embedding lookup (one_hot @ W_ih^T is a gather).
    # Pad the tokens first so the gather lands directly in the final padded
    # shape (no second (T_pad, B_pad, H_pad) materialization).
    tokens = jnp.pad(inputs.T, ((0, T_pad - T), (0, B_pad - B)))          # (T_pad, B_pad)
    xproj = jnp.take(wih_p, tokens, axis=0) + b_p                         # (T_pad, B_pad, H_pad)

    h0 = jnp.pad(state[0], ((0, B_pad - B), (0, H_pad - H)))              # (B_pad, H_pad)

    # ---- recurrent kernel -----------------------------------------------------
    y_pad, hT_pad = pl.pallas_call(
        functools.partial(_rnn_recurrence_kernel, tc=tc, seq_len=seq_len),
        out_shape=(
            jax.ShapeDtypeStruct((T_pad, B_pad, H_pad), y_dtype),         # Y (hidden states)
            jax.ShapeDtypeStruct((B_pad, H_pad), jnp.float32),            # h_T
        ),
        grid_spec=pltpu.PrefetchScalarGridSpec(
            num_scalar_prefetch=0,
            grid=(B_pad // tb, T_pad // tc),
            in_specs=[
                pl.BlockSpec((tc, tb, H_pad), lambda b, c: (c, b, 0)),    # xproj chunk
                pl.BlockSpec((tb, H_pad), lambda b, c: (b, 0)),           # h0
                pl.BlockSpec((H_pad, H_pad), lambda b, c: (0, 0),         # W_hh^T, constant
                             pipeline_mode=pl.Buffered(1)),               # -> single buffer
            ],
            out_specs=[
                pl.BlockSpec((tc, tb, H_pad), lambda b, c: (c, b, 0)),    # Y chunk
                pl.BlockSpec((tb, H_pad), lambda b, c: (b, 0)),           # final state
            ],
            scratch_shapes=[pltpu.VMEM((tb, H_pad), jnp.float32)],        # hidden carry
        ),
        compiler_params=pltpu.CompilerParams(
            dimension_semantics=("parallel", "arbitrary"),  # batch parallel, time serial
            vmem_limit_bytes=_vmem_limit(_ws(tc, tb)),
        ),
    )(xproj, h0, whh_p)

    # ---- hoisted output projection: read y_pad directly (3-D blocks) ---------
    V_pad = _round_up(V, 128)
    if H_pad * V_pad * 4 <= 8 * 1024 * 1024:
        tn = V_pad                     # whole W_lin resident -> single vocab block
    else:
        tn = 512
        V_pad = _round_up(V_pad, tn)
    nj = V_pad // tn

    wlin_p = jnp.pad(params["wlin_t"],
                     ((0, H_pad - H), (0, V_pad - V))).astype(w_dtype)    # (H_pad, V_pad)
    blin_p = jnp.pad(params["blin"], ((0, 0), (0, V_pad - V)))            # (1, V_pad)

    # Grow the head's time block: more rows per matmul (MXU fill), fewer grid steps.
    tcl = tc
    while (T_pad % (tcl * 2) == 0 and tcl * tb < 256
           and 2 * (tcl * 2) * tb * H_pad * y_bytes < 8 * 1024 * 1024):
        tcl *= 2

    if nj == 1:
        w_spec = pl.BlockSpec((H_pad, tn), lambda j, t, b: (0, j),
                              pipeline_mode=pl.Buffered(1))
        b_spec = pl.BlockSpec((1, tn), lambda j, t, b: (0, j),
                              pipeline_mode=pl.Buffered(1))
    else:
        w_spec = pl.BlockSpec((H_pad, tn), lambda j, t, b: (0, j))
        b_spec = pl.BlockSpec((1, tn), lambda j, t, b: (0, j))

    head_ws = (2 * tcl * tb * H_pad * y_bytes
               + (1 if nj == 1 else 2) * H_pad * tn * w_bytes
               + (1 if nj == 1 else 2) * tn * 4
               + 2 * tcl * tb * tn * 4)

    logits_pad = pl.pallas_call(
        _head_kernel,
        out_shape=jax.ShapeDtypeStruct((T_pad, B_pad, V_pad), jnp.float32),
        grid_spec=pltpu.PrefetchScalarGridSpec(
            num_scalar_prefetch=0,
            # Vocab axis outermost: each W_lin tile is DMA'd once and stays
            # resident while the (time, batch) row blocks stream past it.
            grid=(nj, T_pad // tcl, B_pad // tb),
            in_specs=[
                pl.BlockSpec((tcl, tb, H_pad), lambda j, t, b: (t, b, 0)),  # Y block
                w_spec,                                                      # W_lin^T
                b_spec,                                                      # bias
            ],
            out_specs=pl.BlockSpec((tcl, tb, tn), lambda j, t, b: (t, b, j)),
        ),
        compiler_params=pltpu.CompilerParams(
            dimension_semantics=("arbitrary", "parallel", "parallel"),
            vmem_limit_bytes=_vmem_limit(head_ws),
        ),
    )(y_pad, wlin_p, blin_p)

    output = logits_pad[:T, :B, :V].reshape(T * B, V)   # (T*B, V), (t, b) row order
    new_state = hT_pad[:B, :H][None]                    # (1, B, H)
    return output, new_state


def init_params(key, vocab_size, num_hiddens):
    """Parameter init mirroring PyTorch defaults: U(-1/sqrt(H), 1/sqrt(H))."""
    V, H = vocab_size, num_hiddens
    k = 1.0 / jnp.sqrt(jnp.float32(H))
    ks = jax.random.split(key, 6)
    u = lambda kk, shape: jax.random.uniform(kk, shape, jnp.float32, -k, k)
    w_ih = u(ks[0], (H, V))     # PyTorch weight_ih_l0
    w_hh = u(ks[1], (H, H))     # PyTorch weight_hh_l0
    b_ih = u(ks[2], (H,))
    b_hh = u(ks[3], (H,))
    w_lin = u(ks[4], (V, H))    # nn.Linear(H, V).weight
    b_lin = u(ks[5], (V,))
    return {
        "wih_t": w_ih.T,                          # (V, H)  == W_ih^T
        "whh_t": w_hh.T,                          # (H, H)  == W_hh^T
        "b_sum": (b_ih + b_hh).reshape(1, H),     # (1, H)
        "wlin_t": w_lin.T,                        # (H, V)  == W_lin^T
        "blin": b_lin.reshape(1, V),              # (1, V)
    }


def reference_forward(inputs, state, params, vocab_size):
    """Pure-JAX reference of the PyTorch forward, for correctness checking."""
    X = jax.nn.one_hot(inputs.T, vocab_size, dtype=jnp.float32)   # (T, B, V)
    h = state[0]

    def step(h, x):
        h_new = jnp.tanh(x @ params["wih_t"] + h @ params["whh_t"] + params["b_sum"])
        return h_new, h_new

    h_last, Y = jax.lax.scan(step, h, X)
    out = Y.reshape(-1, Y.shape[-1]) @ params["wlin_t"] + params["blin"]
    return out, h_last[None]


if __name__ == "__main__":
    # Small shapes implied by the module: (batch, time) integer tokens.
    batch, seq, vocab_size, num_hiddens = 2, 8, 32, 32

    key = jax.random.PRNGKey(0)
    k_tok, k_par = jax.random.split(key)
    inputs = jax.random.randint(k_tok, (batch, seq), 0, vocab_size, dtype=jnp.int32)
    params = init_params(k_par, vocab_size, num_hiddens)

    # begin_state: zeros of shape (num_directions * num_layers, B, H) = (1, B, H)
    state0 = jnp.zeros((1, batch, num_hiddens), jnp.float32)

    output, state = rnn_model_forward(inputs, state0, params, vocab_size)
    jax.block_until_ready((output, state))

    ref_out, ref_state = reference_forward(inputs, state0, params, vocab_size)
    assert output.shape == (seq * batch, vocab_size)
    assert state.shape == (1, batch, num_hiddens)
    assert jnp.allclose(output, ref_out, atol=1e-5, rtol=1e-5)
    assert jnp.allclose(state, ref_state, atol=1e-5, rtol=1e-5)

    print("KERNEL_OK")
</pallas_src>

<mosaic_0001>
module attributes {stable_mosaic.version = 11 : i64} {
  func.func @_head_kernel(%arg0: i32, %arg1: i32, %arg2: i32, %arg3: memref<8x8x128xf32, #tpu.memory_space<vmem>>, %arg4: memref<128x128xf32, #tpu.memory_space<vmem>>, %arg5: memref<1x128xf32, #tpu.memory_space<vmem>>, %arg6: memref<8x8x128xf32, #tpu.memory_space<vmem>>) attributes {dimension_semantics = [#tpu.dimension_semantics<arbitrary>, #tpu.dimension_semantics<parallel>, #tpu.dimension_semantics<parallel>], iteration_bounds = array<i64: 1, 1, 1>, scalar_prefetch = 0 : i64, scratch_operands = 0 : i64, tpu.core_type = #tpu.core_type<tc>, window_params = [{transform_indices = @transform_0, window_bounds = array<i64: 8, 8, 128>}, {pipeline_mode = #tpu.pipeline_mode<synchronous>, transform_indices = @transform_1, window_bounds = array<i64: 128, 128>}, {pipeline_mode = #tpu.pipeline_mode<synchronous>, transform_indices = @transform_2, window_bounds = array<i64: 1, 128>}, {transform_indices = @transform_3, window_bounds = array<i64: 8, 8, 128>}]} {
    %c0 = arith.constant 0 : index
    %c0_0 = arith.constant 0 : index
    %c0_1 = arith.constant 0 : index
    %0 = vector.load %arg3[%c0, %c0_0, %c0_1] : memref<8x8x128xf32, #tpu.memory_space<vmem>>, vector<8x8x128xf32>
    %1 = vector.shape_cast %0 : vector<8x8x128xf32> to vector<64x128xf32>
    %c0_2 = arith.constant 0 : index
    %c0_3 = arith.constant 0 : index
    %2 = vector.load %arg4[%c0_2, %c0_3] : memref<128x128xf32, #tpu.memory_space<vmem>>, vector<128x128xf32>
    %cst = arith.constant dense<0.000000e+00> : vector<64x128xf32>
    %3 = tpu.matmul %1, %2, %cst {dimension_numbers = #tpu.dot_dimension_numbers<[1], [0], [0], [1], [0, 0, 1, 1], [], []>} : vector<64x128xf32>, vector<128x128xf32>, vector<64x128xf32> -> vector<64x128xf32>
    %c0_4 = arith.constant 0 : index
    %c0_5 = arith.constant 0 : index
    %4 = vector.load %arg5[%c0_4, %c0_5] : memref<1x128xf32, #tpu.memory_space<vmem>>, vector<1x128xf32>
    %5 = vector.broadcast %4 : vector<1x128xf32> to vector<64x128xf32>
    %6 = arith.addf %3, %5 : vector<64x128xf32>
    %7 = vector.shape_cast %6 : vector<64x128xf32> to vector<8x8x128xf32>
    %c0_6 = arith.constant 0 : index
    %c0_7 = arith.constant 0 : index
    %c0_8 = arith.constant 0 : index
    %8 = vector.load %arg6[%c0_6, %c0_7, %c0_8] : memref<8x8x128xf32, #tpu.memory_space<vmem>>, vector<8x8x128xf32>
    tpu.vector_store %arg6[%c0_6, %c0_7, %c0_8], %7 {strides = array<i32>} : memref<8x8x128xf32, #tpu.memory_space<vmem>>, vector<8x8x128xf32>,
    return
  }
  func.func @transform_0(%arg0: i32, %arg1: i32, %arg2: i32) -> (i32, i32, i32) {
    %c0_i32 = arith.constant 0 : i32
    %c0_i32_0 = arith.constant 0 : i32
    return %arg1, %arg2, %c0_i32 : i32, i32, i32
  }
  func.func @transform_1(%arg0: i32, %arg1: i32, %arg2: i32) -> (i32, i32) {
    %c0_i32 = arith.constant 0 : i32
    %c0_i32_0 = arith.constant 0 : i32
    return %c0_i32, %arg0 : i32, i32
  }
  func.func @transform_2(%arg0: i32, %arg1: i32, %arg2: i32) -> (i32, i32) {
    %c0_i32 = arith.constant 0 : i32
    %c0_i32_0 = arith.constant 0 : i32
    return %c0_i32, %arg0 : i32, i32
  }
  func.func @transform_3(%arg0: i32, %arg1: i32, %arg2: i32) -> (i32, i32, i32) {
    %c0_i32 = arith.constant 0 : i32
    return %arg1, %arg2, %arg0 : i32, i32, i32
  }
}

module attributes {stable_mosaic.version = 11 : i64} {
  func.func @_rnn_recurrence_kernel(%arg0: i32, %arg1: i32, %arg2: memref<8x8x128xf32, #tpu.memory_space<vmem>>, %arg3: memref<8x128xf32, #tpu.memory_space<vmem>>, %arg4: memref<128x128xf32, #tpu.memory_space<vmem>>, %arg5: memref<8x8x128xf32, #tpu.memory_space<vmem>>, %arg6: memref<8x128xf32, #tpu.memory_space<vmem>>, %arg7: memref<8x128xf32, #tpu.memory_space<vmem>>) attributes {dimension_semantics = [#tpu.dimension_semantics<parallel>, #tpu.dimension_semantics<arbitrary>], iteration_bounds = array<i64: 1, 1>, scalar_prefetch = 0 : i64, scratch_operands = 1 : i64, tpu.core_type = #tpu.core_type<tc>, window_params = [{transform_indices = @transform_0, window_bounds = array<i64: 8, 8, 128>}, {transform_indices = @transform_1, window_bounds = array<i64: 8, 128>}, {pipeline_mode = #tpu.pipeline_mode<synchronous>, transform_indices = @transform_2, window_bounds = array<i64: 128, 128>}, {transform_indices = @transform_3, window_bounds = array<i64: 8, 8, 128>}, {transform_indices = @transform_4, window_bounds = array<i64: 8, 128>}]} {
    %c0_i32 = arith.constant 0 : i32
    %0 = arith.cmpi eq, %arg1, %c0_i32 : i32
    %1 = arith.extui %0 : i1 to i32
    %c0_i32_0 = arith.constant 0 : i32
    %2 = arith.cmpi ne, %1, %c0_i32_0 : i32
    scf.if %2 {
      %c0_48 = arith.constant 0 : index
      %c0_49 = arith.constant 0 : index
      %89 = vector.load %arg3[%c0_48, %c0_49] : memref<8x128xf32, #tpu.memory_space<vmem>>, vector<8x128xf32>
      %c0_50 = arith.constant 0 : index
      %c0_51 = arith.constant 0 : index
      %90 = vector.load %arg7[%c0_50, %c0_51] : memref<8x128xf32, #tpu.memory_space<vmem>>, vector<8x128xf32>
      tpu.vector_store %arg7[%c0_50, %c0_51], %89 {strides = array<i32>} : memref<8x128xf32, #tpu.memory_space<vmem>>, vector<8x128xf32>,
    } else {
    }
    %c0 = arith.constant 0 : index
    %c0_1 = arith.constant 0 : index
    %3 = vector.load %arg4[%c0, %c0_1] : memref<128x128xf32, #tpu.memory_space<vmem>>, vector<128x128xf32>
    %c0_2 = arith.constant 0 : index
    %c0_3 = arith.constant 0 : index
    %4 = vector.load %arg7[%c0_2, %c0_3] : memref<8x128xf32, #tpu.memory_space<vmem>>, vector<8x128xf32>
    %c0_i32_4 = arith.constant 0 : i32
    %5 = arith.index_cast %c0_i32_4 : i32 to index
    %c0_5 = arith.constant 0 : index
    %c0_6 = arith.constant 0 : index
    %6 = vector.load %arg2[%5, %c0_5, %c0_6] : memref<8x8x128xf32, #tpu.memory_space<vmem>>, vector<1x8x128xf32>
    %7 = vector.shape_cast %6 : vector<1x8x128xf32> to vector<8x128xf32>
    %cst = arith.constant dense<0.000000e+00> : vector<8x128xf32>
    %8 = tpu.matmul %4, %3, %cst {dimension_numbers = #tpu.dot_dimension_numbers<[1], [0], [0], [1], [0, 0, 1, 1], [], []>} : vector<8x128xf32>, vector<128x128xf32>, vector<8x128xf32> -> vector<8x128xf32>
    %9 = arith.addf %7, %8 : vector<8x128xf32>
    %10 = math.tanh %9 : vector<8x128xf32>
    %11 = arith.index_cast %c0_i32_4 : i32 to index
    %c0_7 = arith.constant 0 : index
    %c0_8 = arith.constant 0 : index
    %12 = vector.load %arg5[%11, %c0_7, %c0_8] : memref<8x8x128xf32, #tpu.memory_space<vmem>>, vector<1x8x128xf32>
    %13 = vector.shape_cast %12 : vector<1x8x128xf32> to vector<8x128xf32>
    %14 = vector.shape_cast %10 : vector<8x128xf32> to vector<1x8x128xf32>
    tpu.vector_store %arg5[%11, %c0_7, %c0_8], %14 {strides = array<i32>} : memref<8x8x128xf32, #tpu.memory_space<vmem>>, vector<1x8x128xf32>,
    %c1_i32 = arith.constant 1 : i32
    %15 = arith.index_cast %c1_i32 : i32 to index
    %c0_9 = arith.constant 0 : index
    %c0_10 = arith.constant 0 : index
    %16 = vector.load %arg2[%15, %c0_9, %c0_10] : memref<8x8x128xf32, #tpu.memory_space<vmem>>, vector<1x8x128xf32>
    %17 = vector.shape_cast %16 : vector<1x8x128xf32> to vector<8x128xf32>
    %cst_11 = arith.constant dense<0.000000e+00> : vector<8x128xf32>
    %18 = tpu.matmul %10, %3, %cst_11 {dimension_numbers = #tpu.dot_dimension_numbers<[1], [0], [0], [1], [0, 0, 1, 1], [], []>} : vector<8x128xf32>, vector<128x128xf32>, vector<8x128xf32> -> vector<8x128xf32>
    %19 = arith.addf %17, %18 : vector<8x128xf32>
    %20 = math.tanh %19 : vector<8x128xf32>
    %21 = arith.index_cast %c1_i32 : i32 to index
    %c0_12 = arith.constant 0 : index
    %c0_13 = arith.constant 0 : index
    %22 = vector.load %arg5[%21, %c0_12, %c0_13] : memref<8x8x128xf32, #tpu.memory_space<vmem>>, vector<1x8x128xf32>
    %23 = vector.shape_cast %22 : vector<1x8x128xf32> to vector<8x128xf32>
    %24 = vector.shape_cast %20 : vector<8x128xf32> to vector<1x8x128xf32>
    tpu.vector_store %arg5[%21, %c0_12, %c0_13], %24 {strides = array<i32>} : memref<8x8x128xf32, #tpu.memory_space<vmem>>, vector<1x8x128xf32>,
    %c2_i32 = arith.constant 2 : i32
    %25 = arith.index_cast %c2_i32 : i32 to index
    %c0_14 = arith.constant 0 : index
    %c0_15 = arith.constant 0 : index
    %26 = vector.load %arg2[%25, %c0_14, %c0_15] : memref<8x8x128xf32, #tpu.memory_space<vmem>>, vector<1x8x128xf32>
    %27 = vector.shape_cast %26 : vector<1x8x128xf32> to vector<8x128xf32>
    %cst_16 = arith.constant dense<0.000000e+00> : vector<8x128xf32>
    %28 = tpu.matmul %20, %3, %cst_16 {dimension_numbers = #tpu.dot_dimension_numbers<[1], [0], [0], [1], [0, 0, 1, 1], [], []>} : vector<8x128xf32>, vector<128x128xf32>, vector<8x128xf32> -> vector<8x128xf32>
    %29 = arith.addf %27, %28 : vector<8x128xf32>
    %30 = math.tanh %29 : vector<8x128xf32>
    %31 = arith.index_cast %c2_i32 : i32 to index
    %c0_17 = arith.constant 0 : index
    %c0_18 = arith.constant 0 : index
    %32 = vector.load %arg5[%31, %c0_17, %c0_18] : memref<8x8x128xf32, #tpu.memory_space<vmem>>, vector<1x8x128xf32>
    %33 = vector.shape_cast %32 : vector<1x8x128xf32> to vector<8x128xf32>
    %34 = vector.shape_cast %30 : vector<8x128xf32> to vector<1x8x128xf32>
    tpu.vector_store %arg5[%31, %c0_17, %c0_18], %34 {strides = array<i32>} : memref<8x8x128xf32, #tpu.memory_space<vmem>>, vector<1x8x128xf32>,
    %c3_i32 = arith.constant 3 : i32
    %35 = arith.index_cast %c3_i32 : i32 to index
    %c0_19 = arith.constant 0 : index
    %c0_20 = arith.constant 0 : index
    %36 = vector.load %arg2[%35, %c0_19, %c0_20] : memref<8x8x128xf32, #tpu.memory_space<vmem>>, vector<1x8x128xf32>
    %37 = vector.shape_cast %36 : vector<1x8x128xf32> to vector<8x128xf32>
    %cst_21 = arith.constant dense<0.000000e+00> : vector<8x128xf32>
    %38 = tpu.matmul %30, %3, %cst_21 {dimension_numbers = #tpu.dot_dimension_numbers<[1], [0], [0], [1], [0, 0, 1, 1], [], []>} : vector<8x128xf32>, vector<128x128xf32>, vector<8x128xf32> -> vector<8x128xf32>
    %39 = arith.addf %37, %38 : vector<8x128xf32>
    %40 = math.tanh %39 : vector<8x128xf32>
    %41 = arith.index_cast %c3_i32 : i32 to index
    %c0_22 = arith.constant 0 : index
    %c0_23 = arith.constant 0 : index
    %42 = vector.load %arg5[%41, %c0_22, %c0_23] : memref<8x8x128xf32, #tpu.memory_space<vmem>>, vector<1x8x128xf32>
    %43 = vector.shape_cast %42 : vector<1x8x128xf32> to vector<8x128xf32>
    %44 = vector.shape_cast %40 : vector<8x128xf32> to vector<1x8x128xf32>
    tpu.vector_store %arg5[%41, %c0_22, %c0_23], %44 {strides = array<i32>} : memref<8x8x128xf32, #tpu.memory_space<vmem>>, vector<1x8x128xf32>,
    %c4_i32 = arith.constant 4 : i32
    %45 = arith.index_cast %c4_i32 : i32 to index
    %c0_24 = arith.constant 0 : index
    %c0_25 = arith.constant 0 : index
    %46 = vector.load %arg2[%45, %c0_24, %c0_25] : memref<8x8x128xf32, #tpu.memory_space<vmem>>, vector<1x8x128xf32>
    %47 = vector.shape_cast %46 : vector<1x8x128xf32> to vector<8x128xf32>
    %cst_26 = arith.constant dense<0.000000e+00> : vector<8x128xf32>
    %48 = tpu.matmul %40, %3, %cst_26 {dimension_numbers = #tpu.dot_dimension_numbers<[1], [0], [0], [1], [0, 0, 1, 1], [], []>} : vector<8x128xf32>, vector<128x128xf32>, vector<8x128xf32> -> vector<8x128xf32>
    %49 = arith.addf %47, %48 : vector<8x128xf32>
    %50 = math.tanh %49 : vector<8x128xf32>
    %51 = arith.index_cast %c4_i32 : i32 to index
    %c0_27 = arith.constant 0 : index
    %c0_28 = arith.constant 0 : index
    %52 = vector.load %arg5[%51, %c0_27, %c0_28] : memref<8x8x128xf32, #tpu.memory_space<vmem>>, vector<1x8x128xf32>
    %53 = vector.shape_cast %52 : vector<1x8x128xf32> to vector<8x128xf32>
    %54 = vector.shape_cast %50 : vector<8x128xf32> to vector<1x8x128xf32>
    tpu.vector_store %arg5[%51, %c0_27, %c0_28], %54 {strides = array<i32>} : memref<8x8x128xf32, #tpu.memory_space<vmem>>, vector<1x8x128xf32>,
    %c5_i32 = arith.constant 5 : i32
    %55 = arith.index_cast %c5_i32 : i32 to index
    %c0_29 = arith.constant 0 : index
    %c0_30 = arith.constant 0 : index
    %56 = vector.load %arg2[%55, %c0_29, %c0_30] : memref<8x8x128xf32, #tpu.memory_space<vmem>>, vector<1x8x128xf32>
    %57 = vector.shape_cast %56 : vector<1x8x128xf32> to vector<8x128xf32>
    %cst_31 = arith.constant dense<0.000000e+00> : vector<8x128xf32>
    %58 = tpu.matmul %50, %3, %cst_31 {dimension_numbers = #tpu.dot_dimension_numbers<[1], [0], [0], [1], [0, 0, 1, 1], [], []>} : vector<8x128xf32>, vector<128x128xf32>, vector<8x128xf32> -> vector<8x128xf32>
    %59 = arith.addf %57, %58 : vector<8x128xf32>
    %60 = math.tanh %59 : vector<8x128xf32>
    %61 = arith.index_cast %c5_i32 : i32 to index
    %c0_32 = arith.constant 0 : index
    %c0_33 = arith.constant 0 : index
    %62 = vector.load %arg5[%61, %c0_32, %c0_33] : memref<8x8x128xf32, #tpu.memory_space<vmem>>, vector<1x8x128xf32>
    %63 = vector.shape_cast %62 : vector<1x8x128xf32> to vector<8x128xf32>
    %64 = vector.shape_cast %60 : vector<8x128xf32> to vector<1x8x128xf32>
    tpu.vector_store %arg5[%61, %c0_32, %c0_33], %64 {strides = array<i32>} : memref<8x8x128xf32, #tpu.memory_space<vmem>>, vector<1x8x128xf32>,
    %c6_i32 = arith.constant 6 : i32
    %65 = arith.index_cast %c6_i32 : i32 to index
    %c0_34 = arith.constant 0 : index
    %c0_35 = arith.constant 0 : index
    %66 = vector.load %arg2[%65, %c0_34, %c0_35] : memref<8x8x128xf32, #tpu.memory_space<vmem>>, vector<1x8x128xf32>
    %67 = vector.shape_cast %66 : vector<1x8x128xf32> to vector<8x128xf32>
    %cst_36 = arith.constant dense<0.000000e+00> : vector<8x128xf32>
    %68 = tpu.matmul %60, %3, %cst_36 {dimension_numbers = #tpu.dot_dimension_numbers<[1], [0], [0], [1], [0, 0, 1, 1], [], []>} : vector<8x128xf32>, vector<128x128xf32>, vector<8x128xf32> -> vector<8x128xf32>
    %69 = arith.addf %67, %68 : vector<8x128xf32>
    %70 = math.tanh %69 : vector<8x128xf32>
    %71 = arith.index_cast %c6_i32 : i32 to index
    %c0_37 = arith.constant 0 : index
    %c0_38 = arith.constant 0 : index
    %72 = vector.load %arg5[%71, %c0_37, %c0_38] : memref<8x8x128xf32, #tpu.memory_space<vmem>>, vector<1x8x128xf32>
    %73 = vector.shape_cast %72 : vector<1x8x128xf32> to vector<8x128xf32>
    %74 = vector.shape_cast %70 : vector<8x128xf32> to vector<1x8x128xf32>
    tpu.vector_store %arg5[%71, %c0_37, %c0_38], %74 {strides = array<i32>} : memref<8x8x128xf32, #tpu.memory_space<vmem>>, vector<1x8x128xf32>,
    %c7_i32 = arith.constant 7 : i32
    %75 = arith.index_cast %c7_i32 : i32 to index
    %c0_39 = arith.constant 0 : index
    %c0_40 = arith.constant 0 : index
    %76 = vector.load %arg2[%75, %c0_39, %c0_40] : memref<8x8x128xf32, #tpu.memory_space<vmem>>, vector<1x8x128xf32>
    %77 = vector.shape_cast %76 : vector<1x8x128xf32> to vector<8x128xf32>
    %cst_41 = arith.constant dense<0.000000e+00> : vector<8x128xf32>
    %78 = tpu.matmul %70, %3, %cst_41 {dimension_numbers = #tpu.dot_dimension_numbers<[1], [0], [0], [1], [0, 0, 1, 1], [], []>} : vector<8x128xf32>, vector<128x128xf32>, vector<8x128xf32> -> vector<8x128xf32>
    %79 = arith.addf %77, %78 : vector<8x128xf32>
    %80 = math.tanh %79 : vector<8x128xf32>
    %81 = arith.index_cast %c7_i32 : i32 to index
    %c0_42 = arith.constant 0 : index
    %c0_43 = arith.constant 0 : index
    %82 = vector.load %arg5[%81, %c0_42, %c0_43] : memref<8x8x128xf32, #tpu.memory_space<vmem>>, vector<1x8x128xf32>
    %83 = vector.shape_cast %82 : vector<1x8x128xf32> to vector<8x128xf32>
    %84 = vector.shape_cast %80 : vector<8x128xf32> to vector<1x8x128xf32>
    tpu.vector_store %arg5[%81, %c0_42, %c0_43], %84 {strides = array<i32>} : memref<8x8x128xf32, #tpu.memory_space<vmem>>, vector<1x8x128xf32>,
    %c8_i32 = arith.constant 8 : i32
    %c0_44 = arith.constant 0 : index
    %c0_45 = arith.constant 0 : index
    %85 = vector.load %arg7[%c0_44, %c0_45] : memref<8x128xf32, #tpu.memory_space<vmem>>, vector<8x128xf32>
    tpu.vector_store %arg7[%c0_44, %c0_45], %80 {strides = array<i32>} : memref<8x128xf32, #tpu.memory_space<vmem>>, vector<8x128xf32>,
    %c0_i32_46 = arith.constant 0 : i32
    %86 = arith.cmpi eq, %arg1, %c0_i32_46 : i32
    %87 = arith.extui %86 : i1 to i32
    %c0_i32_47 = arith.constant 0 : i32
    %88 = arith.cmpi ne, %87, %c0_i32_47 : i32
    scf.if %88 {
      %c0_48 = arith.constant 0 : index
      %c0_49 = arith.constant 0 : index
      %89 = vector.load %arg6[%c0_48, %c0_49] : memref<8x128xf32, #tpu.memory_space<vmem>>, vector<8x128xf32>
      tpu.vector_store %arg6[%c0_48, %c0_49], %80 {strides = array<i32>} : memref<8x128xf32, #tpu.memory_space<vmem>>, vector<8x128xf32>,
    } else {
    }
    return
  }
  func.func @transform_0(%arg0: i32, %arg1: i32) -> (i32, i32, i32) {
    %c0_i32 = arith.constant 0 : i32
    %c0_i32_0 = arith.constant 0 : i32
    return %arg1, %arg0, %c0_i32 : i32, i32, i32
  }
  func.func @transform_1(%arg0: i32, %arg1: i32) -> (i32, i32) {
    %c0_i32 = arith.constant 0 : i32
    %c0_i32_0 = arith.constant 0 : i32
    return %arg0, %c0_i32 : i32, i32
  }
  func.func @transform_2(%arg0: i32, %arg1: i32) -> (i32, i32) {
    %c0_i32 = arith.constant 0 : i32
    %c0_i32_0 = arith.constant 0 : i32
    %c0_i32_1 = arith.constant 0 : i32
    return %c0_i32, %c0_i32_0 : i32, i32
  }
  func.func @transform_3(%arg0: i32, %arg1: i32) -> (i32, i32, i32) {
    %c0_i32 = arith.constant 0 : i32
    %c0_i32_0 = arith.constant 0 : i32
    return %arg1, %arg0, %c0_i32 : i32, i32, i32
  }
  func.func @transform_4(%arg0: i32, %arg1: i32) -> (i32, i32) {
    %c0_i32 = arith.constant 0 : i32
    %c0_i32_0 = arith.constant 0 : i32
    return %arg0, %c0_i32 : i32, i32
  }
}

</mosaic_0001>

<bundles_post_ra>
// kernel: rnn_model_forward.3
= control target key start
LH: loop header
LB: loop body
LE: loop exit
PB: predicated region body
PF: predicated region fallthrough
CT: control target
= control target key end

     0   :  { %s398_s1 = inlined_call_operand.vmem [shape: f32[128,128], index: 1, kind: input, shape index: {}]   ;;  %s399_s0 = inlined_call_operand.vmem [shape: f32[8,8,128], index: 0, kind: input, shape index: {}]   ;;  %s400_s2 = inlined_call_operand.vmem [shape: f32[1,128], index: 2, kind: input, shape index: {}]   ;;  %s401_s3 = inlined_call_operand.vmem [shape: f32[8,8,128], index: 3, kind: output, shape index: {}]  }
   0x1   :  { %v22_v0 = vld [vmem:[%s398_s1] sm:$0xff]  ;;  %v23_v1 = vld [vmem:[%s398_s1 + $0x8] sm:$0xff]  ;;  %v24_v2 = vld [vmem:[%s398_s1 + $0x10] sm:$0xff] }
   0x2   :  { %v231_v3 = vpack.c.bf16 %v23_v1, %v22_v0  ;;  %v25_v4 = vld [vmem:[%s398_s1 + $0x18] sm:$0xff]  ;;  %v26_v6 = vld [vmem:[%s398_s1 + $0x20] sm:$0xff]  ;;  %v27_v7 = vld [vmem:[%s398_s1 + $0x28] sm:$0xff] }
   0x3   :  { %v235_v5 = vpack.c.bf16 %v25_v4, %v24_v2  ;;  %v239_v8 = vpack.c.bf16 %v27_v7, %v26_v6  ;;  %v14_v9 = vld [vmem:[%s399_s0] sm:$0xff]  ;;  %v28_v11 = vld [vmem:[%s398_s1 + $0x30] sm:$0xff]  ;;  %v29_v12 = vld [vmem:[%s398_s1 + $0x38] sm:$0xff] }
   0x4   :  { %232 = vmatprep.subr.bf16.mxu0 %v231_v3  ;;  %263 = vmatprep.subr.bf16.mxu1 %v231_v3  ;;  %v18_v10 = vld [vmem:[%s399_s0 + $0x20] sm:$0xff]  ;;  %v243_v13 = vpack.c.bf16 %v29_v12, %v28_v11  ;;  %v31_v15 = vld [vmem:[%s398_s1 + $0x48] sm:$0xff]  ;;  %v32_v17 = vld [vmem:[%s398_s1 + $0x50] sm:$0xff] }
   0x5   :  { %234 = vmatpush3.bf16.msra.mxu0 %v231_v3  ;;  %271 = vmatpush3.bf16.msra.mxu1 %v231_v3  ;;  %v30_v14 = vld [vmem:[%s398_s1 + $0x40] sm:$0xff]  ;;  %v33_v18 = vld [vmem:[%s398_s1 + $0x58] sm:$0xff]  ;;  %v35_v21 = vld [vmem:[%s398_s1 + $0x68] sm:$0xff] }
   0x6   :  { %236 = vmatprep.subr.bf16.mxu0 %v235_v5  ;;  %264 = vmatprep.subr.bf16.mxu1 %v235_v5  ;;  %v247_v16 = vpack.c.bf16 %v31_v15, %v30_v14  ;;  %v251_v19 = vpack.c.bf16 %v33_v18, %v32_v17  ;;  %v34_v20 = vld [vmem:[%s398_s1 + $0x60] sm:$0xff]  ;;  %v36_v23 = vld [vmem:[%s398_s1 + $0x70] sm:$0xff]  ;;  %v37_v24 = vld [vmem:[%s398_s1 + $0x78] sm:$0xff] }
   0x7   :  { %219 = vmatprep.mubr.f32.mxu0 %v14_v9  ;;  %225 = vmatprep.mubr.f32.mxu1 %v18_v10  ;;  %v255_v22 = vpack.c.bf16 %v35_v21, %v34_v20  ;;  %v259_v25 = vpack.c.bf16 %v37_v24, %v36_v23  ;;  %v15_v26 = vld [vmem:[%s399_s0 + $0x8] sm:$0xff]  ;;  %v16_v28 = vld [vmem:[%s399_s0 + $0x10] sm:$0xff]  ;;  %v17_v30 = vld [vmem:[%s399_s0 + $0x18] sm:$0xff] }
   0x8   :  { %v19_v27 = vld [vmem:[%s399_s0 + $0x28] sm:$0xff]  ;;  %v20_v29 = vld [vmem:[%s399_s0 + $0x30] sm:$0xff]  ;;  %v21_v31 = vld [vmem:[%s399_s0 + $0x38] sm:$0xff] }
   0x9   :  { %238 = vmatpush3.bf16.msra.mxu0 %v235_v5  ;;  %272 = vmatpush3.bf16.msra.mxu1 %v235_v5  ;;  %v162_v32 = vld [vmem:[%s400_s2] ss:$0 sm:$0xff] }
   0xa   :  { %240 = vmatprep.subr.bf16.mxu0 %v239_v8  ;;  %265 = vmatprep.subr.bf16.mxu1 %v239_v8 }
   0xd   :  { %242 = vmatpush3.bf16.msra.mxu0 %v239_v8  ;;  %273 = vmatpush3.bf16.msra.mxu1 %v239_v8 }
   0xe   :  { %244 = vmatprep.subr.bf16.mxu0 %v243_v13  ;;  %266 = vmatprep.subr.bf16.mxu1 %v243_v13 }
  0x11   :  { %246 = vmatpush3.bf16.msra.mxu0 %v243_v13  ;;  %274 = vmatpush3.bf16.msra.mxu1 %v243_v13 }
  0x12   :  { %248 = vmatprep.subr.bf16.mxu0 %v247_v16  ;;  %267 = vmatprep.subr.bf16.mxu1 %v247_v16 }
  0x15   :  { %250 = vmatpush3.bf16.msra.mxu0 %v247_v16  ;;  %275 = vmatpush3.bf16.msra.mxu1 %v247_v16 }
  0x16   :  { %252 = vmatprep.subr.bf16.mxu0 %v251_v19  ;;  %268 = vmatprep.subr.bf16.mxu1 %v251_v19 }
  0x19   :  { %254 = vmatpush3.bf16.msra.mxu0 %v251_v19  ;;  %276 = vmatpush3.bf16.msra.mxu1 %v251_v19 }
  0x1a   :  { %256 = vmatprep.subr.bf16.mxu0 %v255_v22  ;;  %269 = vmatprep.subr.bf16.mxu1 %v255_v22 }
  0x1d   :  { %258 = vmatpush3.bf16.msra.mxu0 %v255_v22  ;;  %277 = vmatpush3.bf16.msra.mxu1 %v255_v22 }
  0x1e   :  { %260 = vmatprep.subr.bf16.mxu0 %v259_v25  ;;  %270 = vmatprep.subr.bf16.mxu1 %v259_v25 }
  0x21   :  { %262 = vmatpush3.bf16.msra.mxu0 %v259_v25  ;;  %278 = vmatpush3.bf16.msra.mxu1 %v259_v25 }
  0x24   :  { %220 = vmatmul.mubr.f32.vlgmr.msra.gmra.mrb[0].mxu0 %v15_v26  ;;  %226 = vmatmul.mubr.f32.vlgmr.msra.gmra.mrb[0].mxu1 %v19_v27 }
  0x25   :  { %222 = vmatprep.mubr.f32.mxu0 %v16_v28  ;;  %228 = vmatprep.mubr.f32.mxu1 %v20_v29 }
  0x28   :  { %223 = vmatmul.mubr.f32.gmra.mrb[2].mxu0 %v17_v30  ;;  %229 = vmatmul.mubr.f32.gmra.mrb[2].mxu1 %v21_v31 }
  0xf7   :  { %v221_v33 = vpop.f32.mrb[0].mxu0  ;;  %v227_v34 = vpop.f32.mrb[0].mxu1 }
  0xf8   :  { %v117_v35 = vadd.f32 %v221_v33, %v162_v32  ;;  %v137_v36 = vadd.f32 %v227_v34, %v162_v32  ;;  %v111_v37 = vpop.f32.mrb[1].mxu0  ;;  %v131_v38 = vpop.f32.mrb[1].mxu1 }
  0xf9   :  { %v112_v39 = vadd.f32 %v162_v32, %v111_v37  ;;  %v132_v40 = vadd.f32 %v162_v32, %v131_v38 }
  0xfa   :  { %151 = vst [vmem:[%s401_s3 + $0x8] sm:$0xff] %v117_v35  ;;  %155 = vst [vmem:[%s401_s3 + $0x28] sm:$0xff] %v137_v36 }
  0xfb   :  { %150 = vst [vmem:[%s401_s3] sm:$0xff] %v112_v39  ;;  %154 = vst [vmem:[%s401_s3 + $0x20] sm:$0xff] %v132_v40  ;;  %v224_v41 = vpop.f32.mrb[2].mxu0  ;;  %v230_v42 = vpop.f32.mrb[2].mxu1 }
  0xfc   :  { %v127_v43 = vadd.f32 %v224_v41, %v162_v32  ;;  %v147_v44 = vadd.f32 %v230_v42, %v162_v32  ;;  %v121_v45 = vpop.f32.mrb[3].mxu0  ;;  %v141_v46 = vpop.f32.mrb[3].mxu1 }
  0xfd   :  { %v122_v47 = vadd.f32 %v162_v32, %v121_v45  ;;  %v142_v48 = vadd.f32 %v162_v32, %v141_v46 }
  0xfe   :  { %153 = vst [vmem:[%s401_s3 + $0x18] sm:$0xff] %v127_v43  ;;  %157 = vst [vmem:[%s401_s3 + $0x38] sm:$0xff] %v147_v44 }
  0xff   :  { %152 = vst [vmem:[%s401_s3 + $0x10] sm:$0xff] %v122_v47  ;;  %156 = vst [vmem:[%s401_s3 + $0x30] sm:$0xff] %v142_v48 }

// kernel: rnn_model_forward.2
= control target key start
LH: loop header
LB: loop body
LE: loop exit
PB: predicated region body
PF: predicated region fallthrough
CT: control target
= control target key end

     0   :  { %v1299_v0 = vmov 0.0|0.0   ;;  %vm1300_vm0 = vmmov 0   ;;  %v1301_v4 = vmov 0.0   ;;  %s1589_s2 = inlined_call_operand.vmem [shape: f32[128,128], index: 2, kind: input, shape index: {}]   ;;  %s1590_s1 = inlined_call_operand.vmem [shape: f32[8,128], index: 1, kind: input, shape index: {}]   ;;  %s1591_s0 = inlined_call_operand.vmem [shape: f32[8,8,128], index: 0, kind: input, shape index: {}]   ;;  %s1592_s3 = inlined_call_operand.vmem [shape: f32[8,8,128], index: 3, kind: output, shape index: {0}]   ;;  %s1593_s4 = inlined_call_operand.vmem [shape: f32[8,128], index: 4, kind: output, shape index: {1}]  }
   0x1   :  { %1088 = vmatprep.subr.bf16.mxu0 %v1299_v0  ;;  %v22_v1 = vld [vmem:[%s1589_s2] sm:$0xff]  ;;  %v23_v2 = vld [vmem:[%s1589_s2 + $0x8] sm:$0xff]  ;;  %v24_v3 = vld [vmem:[%s1589_s2 + $0x10] sm:$0xff]  ;;  %840 = vmatprep.mubr.msk.f32.mxu0 %vm1300_vm0, %v1301_v4 }
   0x2   :  { %v1339_v5 = vpack.c.bf16 %v23_v2, %v22_v1  ;;  %v25_v6 = vld [vmem:[%s1589_s2 + $0x18] sm:$0xff]  ;;  %1112 = vmatprep.subr.bf16.mxu1 %v1299_v0  ;;  %875 = vmatprep.mubr.msk.f32.mxu1 %vm1300_vm0, %v1301_v4  ;;  %v26_v8 = vld [vmem:[%s1589_s2 + $0x20] sm:$0xff]  ;;  %v27_v9 = vld [vmem:[%s1589_s2 + $0x28] sm:$0xff] }
   0x3   :  { %v1348_v7 = vpack.c.bf16 %v25_v6, %v24_v3  ;;  %v1360_v10 = vpack.c.bf16 %v27_v9, %v26_v8  ;;  %v28_v11 = vld [vmem:[%s1589_s2 + $0x30] sm:$0xff]  ;;  %v29_v12 = vld [vmem:[%s1589_s2 + $0x38] sm:$0xff]  ;;  %v30_v14 = vld [vmem:[%s1589_s2 + $0x40] sm:$0xff] }
   0x4   :  { %1090 = vmatpush3.bf16.msra.mxu0 %v1339_v5  ;;  %1114 = vmatpush3.bf16.msra.mxu1 %v1339_v5  ;;  %v1372_v13 = vpack.c.bf16 %v29_v12, %v28_v11  ;;  %v31_v15 = vld [vmem:[%s1589_s2 + $0x48] sm:$0xff]  ;;  %v32_v17 = vld [vmem:[%s1589_s2 + $0x50] sm:$0xff]  ;;  %v33_v18 = vld [vmem:[%s1589_s2 + $0x58] sm:$0xff] }
   0x5   :  { %1091 = vmatprep.subr.bf16.mxu0 %v1299_v0  ;;  %1115 = vmatprep.subr.bf16.mxu1 %v1299_v0  ;;  %v1384_v16 = vpack.c.bf16 %v31_v15, %v30_v14  ;;  %v1396_v19 = vpack.c.bf16 %v33_v18, %v32_v17  ;;  %v34_v20 = vld [vmem:[%s1589_s2 + $0x60] sm:$0xff]  ;;  %v35_v21 = vld [vmem:[%s1589_s2 + $0x68] sm:$0xff]  ;;  %v36_v23 = vld [vmem:[%s1589_s2 + $0x70] sm:$0xff] }
   0x6   :  { %v1408_v22 = vpack.c.bf16 %v35_v21, %v34_v20  ;;  %v37_v24 = vld [vmem:[%s1589_s2 + $0x78] sm:$0xff]  ;;  %v20_v26 = vld [vmem:[%s1590_s1] sm:$0xff]  ;;  %v658_v32 = vld [vmem:[%s1591_s0 + $0x8] sm:$0xff] }
   0x7   :  { %v1420_v25 = vpack.c.bf16 %v37_v24, %v36_v23  ;;  %v39_v27 = vld [vmem:[%s1591_s0] sm:$0xff]  ;;  %v660_v37 = vld [vmem:[%s1591_s0 + $0x10] sm:$0xff]  ;;  %v662_v42 = vld [vmem:[%s1591_s0 + $0x18] sm:$0xff] }
   0x8   :  { %1093 = vmatpush3.bf16.msra.mxu0 %v1348_v7  ;;  %1117 = vmatpush3.bf16.msra.mxu1 %v1348_v7  ;;  %v664_v47 = vld [vmem:[%s1591_s0 + $0x20] sm:$0xff]  ;;  %v666_v52 = vld [vmem:[%s1591_s0 + $0x28] sm:$0xff]  ;;  %v668_v57 = vld [vmem:[%s1591_s0 + $0x30] sm:$0xff] }
   0x9   :  { %1094 = vmatprep.subr.bf16.mxu0 %v1299_v0  ;;  %1118 = vmatprep.subr.bf16.mxu1 %v1299_v0  ;;  %v670_v62 = vld [vmem:[%s1591_s0 + $0x38] sm:$0xff] }
   0xc   :  { %1096 = vmatpush3.bf16.msra.mxu0 %v1360_v10  ;;  %1120 = vmatpush3.bf16.msra.mxu1 %v1360_v10 }
   0xd   :  { %1097 = vmatprep.subr.bf16.mxu0 %v1299_v0  ;;  %1121 = vmatprep.subr.bf16.mxu1 %v1299_v0 }
  0x10   :  { %1099 = vmatpush3.bf16.msra.mxu0 %v1372_v13  ;;  %1123 = vmatpush3.bf16.msra.mxu1 %v1372_v13 }
  0x11   :  { %1100 = vmatprep.subr.bf16.mxu0 %v1299_v0  ;;  %1124 = vmatprep.subr.bf16.mxu1 %v1299_v0 }
  0x14   :  { %1102 = vmatpush3.bf16.msra.mxu0 %v1384_v16  ;;  %1126 = vmatpush3.bf16.msra.mxu1 %v1384_v16 }
  0x15   :  { %1103 = vmatprep.subr.bf16.mxu0 %v1299_v0  ;;  %1127 = vmatprep.subr.bf16.mxu1 %v1299_v0 }
  0x18   :  { %1105 = vmatpush3.bf16.msra.mxu0 %v1396_v19  ;;  %1129 = vmatpush3.bf16.msra.mxu1 %v1396_v19 }
  0x19   :  { %1106 = vmatprep.subr.bf16.mxu0 %v1299_v0  ;;  %1130 = vmatprep.subr.bf16.mxu1 %v1299_v0 }
  0x1c   :  { %1108 = vmatpush3.bf16.msra.mxu0 %v1408_v22  ;;  %1132 = vmatpush3.bf16.msra.mxu1 %v1408_v22 }
  0x1d   :  { %1109 = vmatprep.subr.bf16.mxu0 %v1299_v0  ;;  %1133 = vmatprep.subr.bf16.mxu1 %v1299_v0 }
  0x20   :  { %1111 = vmatpush3.bf16.msra.mxu0 %v1420_v25  ;;  %1135 = vmatpush3.bf16.msra.mxu1 %v1420_v25 }
  0x21   :  { %1136 = vmatprep.subr.bf16.mxu0 %v1299_v0  ;;  %1160 = vmatprep.subr.bf16.mxu1 %v1299_v0 }
  0x23   :  { %841 = vmatmul.mubr.f32.vlgmr.msra.gmra.mrb[0].mxu0 %v20_v26 }
  0x24   :  { %1138 = vmatpush3.bf16.msra.mxu0 %v1339_v5  ;;  %910 = vmatprep.mubr.msk.f32.mxu0 %vm1300_vm0, %v1301_v4 }
  0x25   :  { %1139 = vmatprep.subr.bf16.mxu0 %v1299_v0 }
  0x28   :  { %1141 = vmatpush3.bf16.msra.mxu0 %v1348_v7 }
  0x29   :  { %1142 = vmatprep.subr.bf16.mxu0 %v1299_v0 }
  0x2c   :  { %1144 = vmatpush3.bf16.msra.mxu0 %v1360_v10 }
  0x2d   :  { %1145 = vmatprep.subr.bf16.mxu0 %v1299_v0 }
  0x30   :  { %1147 = vmatpush3.bf16.msra.mxu0 %v1372_v13 }
  0x31   :  { %1148 = vmatprep.subr.bf16.mxu0 %v1299_v0 }
  0x34   :  { %1150 = vmatpush3.bf16.msra.mxu0 %v1384_v16 }
  0x35   :  { %1151 = vmatprep.subr.bf16.mxu0 %v1299_v0 }
  0x38   :  { %1153 = vmatpush3.bf16.msra.mxu0 %v1396_v19 }
  0x39   :  { %1154 = vmatprep.subr.bf16.mxu0 %v1299_v0 }
  0x3c   :  { %1156 = vmatpush3.bf16.msra.mxu0 %v1408_v22 }
  0x3d   :  { %1157 = vmatprep.subr.bf16.mxu0 %v1299_v0 }
  0x40   :  { %1159 = vmatpush3.bf16.msra.mxu0 %v1420_v25 }
  0x41   :  { %1184 = vmatprep.subr.bf16.mxu0 %v1299_v0 }
  0xf6   :  { %v106_v28 = vpop.f32.mrb[0].mxu0 }
  0xf7   :  { %v110_v29 = vadd.f32 %v106_v28, %v39_v27  ;;  %v842_v30 = vpop.f32.mrb[1].mxu0 }
  0xf9   :  { %1283 = vtanh.f32 %v110_v29 }
 0x103   :  { %v1284_v31 = vpop.eup %1283 }
 0x104   :  { %112 = vst [vmem:[%s1592_s3] sm:$0xff] %v1284_v31  ;;  %876 = vmatmul.mubr.f32.vlgmr.msra.gmra.mrb[0].mxu1 %v1284_v31 }
 0x105   :  { %1162 = vmatpush3.bf16.msra.mxu1 %v1339_v5  ;;  %945 = vmatprep.mubr.msk.f32.mxu1 %vm1300_vm0, %v1301_v4 }
 0x106   :  { %1163 = vmatprep.subr.bf16.mxu1 %v1299_v0 }
 0x109   :  { %1165 = vmatpush3.bf16.msra.mxu1 %v1348_v7 }
 0x10a   :  { %1166 = vmatprep.subr.bf16.mxu1 %v1299_v0 }
 0x10d   :  { %1168 = vmatpush3.bf16.msra.mxu1 %v1360_v10 }
 0x10e   :  { %1169 = vmatprep.subr.bf16.mxu1 %v1299_v0 }
 0x111   :  { %1171 = vmatpush3.bf16.msra.mxu1 %v1372_v13 }
 0x112   :  { %1172 = vmatprep.subr.bf16.mxu1 %v1299_v0 }
 0x115   :  { %1174 = vmatpush3.bf16.msra.mxu1 %v1384_v16 }
 0x116   :  { %1175 = vmatprep.subr.bf16.mxu1 %v1299_v0 }
 0x119   :  { %1177 = vmatpush3.bf16.msra.mxu1 %v1396_v19 }
 0x11a   :  { %1178 = vmatprep.subr.bf16.mxu1 %v1299_v0 }
 0x11d   :  { %1180 = vmatpush3.bf16.msra.mxu1 %v1408_v22 }
 0x11e   :  { %1181 = vmatprep.subr.bf16.mxu1 %v1299_v0 }
 0x121   :  { %1183 = vmatpush3.bf16.msra.mxu1 %v1420_v25 }
 0x122   :  { %1208 = vmatprep.subr.bf16.mxu1 %v1299_v0 }
 0x1d7   :  { %v181_v33 = vpop.f32.mrb[0].mxu1 }
 0x1d8   :  { %v185_v34 = vadd.f32 %v658_v32, %v181_v33  ;;  %v877_v35 = vpop.f32.mrb[1].mxu1 }
 0x1da   :  { %1285 = vtanh.f32 %v185_v34 }
 0x1e4   :  { %v1286_v36 = vpop.eup %1285 }
 0x1e5   :  { %659 = vst [vmem:[%s1592_s3 + $0x8] sm:$0xff] %v1286_v36  ;;  %911 = vmatmul.mubr.f32.vlgmr.msra.gmra.mrb[2].mxu0 %v1286_v36 }
 0x1e6   :  { %1186 = vmatpush3.bf16.msra.mxu0 %v1339_v5  ;;  %980 = vmatprep.mubr.msk.f32.mxu0 %vm1300_vm0, %v1301_v4 }
 0x1e7   :  { %1187 = vmatprep.subr.bf16.mxu0 %v1299_v0 }
 0x1ea   :  { %1189 = vmatpush3.bf16.msra.mxu0 %v1348_v7 }
 0x1eb   :  { %1190 = vmatprep.subr.bf16.mxu0 %v1299_v0 }
 0x1ee   :  { %1192 = vmatpush3.bf16.msra.mxu0 %v1360_v10 }
 0x1ef   :  { %1193 = vmatprep.subr.bf16.mxu0 %v1299_v0 }
 0x1f2   :  { %1195 = vmatpush3.bf16.msra.mxu0 %v1372_v13 }
 0x1f3   :  { %1196 = vmatprep.subr.bf16.mxu0 %v1299_v0 }
 0x1f6   :  { %1198 = vmatpush3.bf16.msra.mxu0 %v1384_v16 }
 0x1f7   :  { %1199 = vmatprep.subr.bf16.mxu0 %v1299_v0 }
 0x1fa   :  { %1201 = vmatpush3.bf16.msra.mxu0 %v1396_v19 }
 0x1fb   :  { %1202 = vmatprep.subr.bf16.mxu0 %v1299_v0 }
 0x1fe   :  { %1204 = vmatpush3.bf16.msra.mxu0 %v1408_v22 }
 0x1ff   :  { %1205 = vmatprep.subr.bf16.mxu0 %v1299_v0 }
 0x202   :  { %1207 = vmatpush3.bf16.msra.mxu0 %v1420_v25 }
 0x203   :  { %1232 = vmatprep.subr.bf16.mxu0 %v1299_v0 }
 0x2b8   :  { %v257_v38 = vpop.f32.mrb[2].mxu0 }
 0x2b9   :  { %v261_v39 = vadd.f32 %v660_v37, %v257_v38  ;;  %v912_v40 = vpop.f32.mrb[3].mxu0 }
 0x2bb   :  { %1287 = vtanh.f32 %v261_v39 }
 0x2c5   :  { %v1288_v41 = vpop.eup %1287 }
 0x2c6   :  { %661 = vst [vmem:[%s1592_s3 + $0x10] sm:$0xff] %v1288_v41  ;;  %946 = vmatmul.mubr.f32.vlgmr.msra.gmra.mrb[2].mxu1 %v1288_v41 }
 0x2c7   :  { %1210 = vmatpush3.bf16.msra.mxu1 %v1339_v5  ;;  %1015 = vmatprep.mubr.msk.f32.mxu1 %vm1300_vm0, %v1301_v4 }
 0x2c8   :  { %1211 = vmatprep.subr.bf16.mxu1 %v1299_v0 }
 0x2cb   :  { %1213 = vmatpush3.bf16.msra.mxu1 %v1348_v7 }
 0x2cc   :  { %1214 = vmatprep.subr.bf16.mxu1 %v1299_v0 }
 0x2cf   :  { %1216 = vmatpush3.bf16.msra.mxu1 %v1360_v10 }
 0x2d0   :  { %1217 = vmatprep.subr.bf16.mxu1 %v1299_v0 }
 0x2d3   :  { %1219 = vmatpush3.bf16.msra.mxu1 %v1372_v13 }
 0x2d4   :  { %1220 = vmatprep.subr.bf16.mxu1 %v1299_v0 }
 0x2d7   :  { %1222 = vmatpush3.bf16.msra.mxu1 %v1384_v16 }
 0x2d8   :  { %1223 = vmatprep.subr.bf16.mxu1 %v1299_v0 }
 0x2db   :  { %1225 = vmatpush3.bf16.msra.mxu1 %v1396_v19 }
 0x2dc   :  { %1226 = vmatprep.subr.bf16.mxu1 %v1299_v0 }
 0x2df   :  { %1228 = vmatpush3.bf16.msra.mxu1 %v1408_v22 }
 0x2e0   :  { %1229 = vmatprep.subr.bf16.mxu1 %v1299_v0 }
 0x2e3   :  { %1231 = vmatpush3.bf16.msra.mxu1 %v1420_v25 }
 0x2e4   :  { %1256 = vmatprep.subr.bf16.mxu1 %v1299_v0 }
 0x399   :  { %v333_v43 = vpop.f32.mrb[2].mxu1 }
 0x39a   :  { %v337_v44 = vadd.f32 %v662_v42, %v333_v43  ;;  %v947_v45 = vpop.f32.mrb[3].mxu1 }
 0x39c   :  { %1289 = vtanh.f32 %v337_v44 }
 0x3a6   :  { %v1290_v46 = vpop.eup %1289 }
 0x3a7   :  { %663 = vst [vmem:[%s1592_s3 + $0x18] sm:$0xff] %v1290_v46  ;;  %981 = vmatmul.mubr.f32.vlgmr.msra.gmra.mrb[4].mxu0 %v1290_v46 }
 0x3a8   :  { %1234 = vmatpush3.bf16.msra.mxu0 %v1339_v5  ;;  %1050 = vmatprep.mubr.msk.f32.mxu0 %vm1300_vm0, %v1301_v4 }
 0x3a9   :  { %1235 = vmatprep.subr.bf16.mxu0 %v1299_v0 }
 0x3ac   :  { %1237 = vmatpush3.bf16.msra.mxu0 %v1348_v7 }
 0x3ad   :  { %1238 = vmatprep.subr.bf16.mxu0 %v1299_v0 }
 0x3b0   :  { %1240 = vmatpush3.bf16.msra.mxu0 %v1360_v10 }
 0x3b1   :  { %1241 = vmatprep.subr.bf16.mxu0 %v1299_v0 }
 0x3b4   :  { %1243 = vmatpush3.bf16.msra.mxu0 %v1372_v13 }
 0x3b5   :  { %1244 = vmatprep.subr.bf16.mxu0 %v1299_v0 }
 0x3b8   :  { %1246 = vmatpush3.bf16.msra.mxu0 %v1384_v16 }
 0x3b9   :  { %1247 = vmatprep.subr.bf16.mxu0 %v1299_v0 }
 0x3bc   :  { %1249 = vmatpush3.bf16.msra.mxu0 %v1396_v19 }
 0x3bd   :  { %1250 = vmatprep.subr.bf16.mxu0 %v1299_v0 }
 0x3c0   :  { %1252 = vmatpush3.bf16.msra.mxu0 %v1408_v22 }
 0x3c1   :  { %1253 = vmatprep.subr.bf16.mxu0 %v1299_v0 }
 0x3c4   :  { %1255 = vmatpush3.bf16.msra.mxu0 %v1420_v25 }
 0x47a   :  { %v409_v48 = vpop.f32.mrb[4].mxu0 }
 0x47b   :  { %v413_v49 = vadd.f32 %v664_v47, %v409_v48  ;;  %v982_v50 = vpop.f32.mrb[5].mxu0 }
 0x47d   :  { %1291 = vtanh.f32 %v413_v49 }
 0x487   :  { %v1292_v51 = vpop.eup %1291 }
 0x488   :  { %665 = vst [vmem:[%s1592_s3 + $0x20] sm:$0xff] %v1292_v51  ;;  %1016 = vmatmul.mubr.f32.vlgmr.msra.gmra.mrb[4].mxu1 %v1292_v51 }
 0x489   :  { %1258 = vmatpush3.bf16.msra.mxu1 %v1339_v5  ;;  %1085 = vmatprep.mubr.msk.f32.mxu1 %vm1300_vm0, %v1301_v4 }
 0x48a   :  { %1259 = vmatprep.subr.bf16.mxu1 %v1299_v0 }
 0x48d   :  { %1261 = vmatpush3.bf16.msra.mxu1 %v1348_v7 }
 0x48e   :  { %1262 = vmatprep.subr.bf16.mxu1 %v1299_v0 }
 0x491   :  { %1264 = vmatpush3.bf16.msra.mxu1 %v1360_v10 }
 0x492   :  { %1265 = vmatprep.subr.bf16.mxu1 %v1299_v0 }
 0x495   :  { %1267 = vmatpush3.bf16.msra.mxu1 %v1372_v13 }
 0x496   :  { %1268 = vmatprep.subr.bf16.mxu1 %v1299_v0 }
 0x499   :  { %1270 = vmatpush3.bf16.msra.mxu1 %v1384_v16 }
 0x49a   :  { %1271 = vmatprep.subr.bf16.mxu1 %v1299_v0 }
 0x49d   :  { %1273 = vmatpush3.bf16.msra.mxu1 %v1396_v19 }
 0x49e   :  { %1274 = vmatprep.subr.bf16.mxu1 %v1299_v0 }
 0x4a1   :  { %1276 = vmatpush3.bf16.msra.mxu1 %v1408_v22 }
 0x4a2   :  { %1277 = vmatprep.subr.bf16.mxu1 %v1299_v0 }
 0x4a5   :  { %1279 = vmatpush3.bf16.msra.mxu1 %v1420_v25 }
 0x55b   :  { %v485_v53 = vpop.f32.mrb[4].mxu1 }
 0x55c   :  { %v489_v54 = vadd.f32 %v666_v52, %v485_v53  ;;  %v1017_v55 = vpop.f32.mrb[5].mxu1 }
 0x55e   :  { %1293 = vtanh.f32 %v489_v54 }
 0x568   :  { %v1294_v56 = vpop.eup %1293 }
 0x569   :  { %667 = vst [vmem:[%s1592_s3 + $0x28] sm:$0xff] %v1294_v56  ;;  %1051 = vmatmul.mubr.f32.vlgmr.msra.gmra.mrb[6].mxu0 %v1294_v56 }
 0x63c   :  { %v561_v58 = vpop.f32.mrb[6].mxu0 }
 0x63d   :  { %v565_v59 = vadd.f32 %v668_v57, %v561_v58  ;;  %v1052_v60 = vpop.f32.mrb[7].mxu0 }
 0x63f   :  { %1295 = vtanh.f32 %v565_v59 }
 0x649   :  { %v1296_v61 = vpop.eup %1295 }
 0x64a   :  { %669 = vst [vmem:[%s1592_s3 + $0x30] sm:$0xff] %v1296_v61  ;;  %1086 = vmatmul.mubr.f32.vlgmr.msra.gmra.mrb[6].mxu1 %v1296_v61 }
 0x71d   :  { %v637_v63 = vpop.f32.mrb[6].mxu1 }
 0x71e   :  { %v641_v0 = vadd.f32 %v670_v62, %v637_v63  ;;  %v1087_v1 = vpop.f32.mrb[7].mxu1 }
 0x720   :  { %1297 = vtanh.f32 %v641_v0 }
 0x72a   :  { %v1298_v2 = vpop.eup %1297 }
 0x72b   :  { %671 = vst [vmem:[%s1592_s3 + $0x38] sm:$0xff] %v1298_v2  ;;  %649 = vst [vmem:[%s1593_s4] sm:$0xff] %v1298_v2 }

</bundles_post_ra>
